<compile_context>
chip_gen: v7x
topology: tpu7x:2x2x1
jax: 0.10.0
libtpu: 0.0.40
codegen_flags: <defaults>
</compile_context>

<pallas_src>
import jax
import jax.numpy as jnp
from jax.experimental import pallas as pl
from jax.experimental.pallas import tpu as pltpu


# ---------------------------------------------------------------------------
# Kernels
# ---------------------------------------------------------------------------

def _chunk_logits(x_ref, dst_ref, typ_ref, w_ref, b_ref, en_ref, et_ref, s_ref):
    """Per-(batch-tile, K-chunk) logits contribution.

    x_ref   : [TB, Din]            activations (bf16 or f32)
    dst_ref : [TB, Np]     f32     dst_state tile (lane-padded to Np >= 8)
    typ_ref : [TB, Tp]     f32     type_state tile (lane-padded to Tp >= 8)
    w_ref   : [Din, kb*Dout]       fused per-layer weights, chunk kc
    b_ref   : [1,  kb*Dout] f32    per-layer biases, flattened, chunk kc
    en_ref  : [Np, kb*Dout] f32    0/1 selector: column (j,o) -> node of layer j
    et_ref  : [Tp, kb*Dout] f32    0/1 selector: column (j,o) -> type of layer j
    s_ref   : [kb*Dout, Dout] f32  0/1 grouped-sum matrix: (j,o) -> o
    returns : [TB, Dout]   f32     sum_j coef_j * (x @ W_j^T + b_j)
    """
    # All kb linear layers fused into the N dimension of one MXU matmul.
    y = jnp.dot(x_ref[...], w_ref[...], preferred_element_type=jnp.float32)
    # coef[b, j*Dout+o] = dst[b, k//T] * type[b, k%T]; two tiny selector matmuls
    # keep this fully lane-dense (no sublane broadcast / relayout work).
    coef = (jnp.dot(dst_ref[...], en_ref[...], preferred_element_type=jnp.float32)
            * jnp.dot(typ_ref[...], et_ref[...], preferred_element_type=jnp.float32))
    # Bias folded additively, coef weighting on the VPU (lane-dense), grouped
    # reduction over the kb fused layers as a 0/1 matmul on the MXU.
    return jnp.dot((y + b_ref[...]) * coef, s_ref[...],
                   preferred_element_type=jnp.float32)


def _mtc_kernel_direct(x_ref, dst_ref, typ_ref, w_ref, b_ref, en_ref, et_ref,
                       s_ref, o_ref):
    """Single K-chunk case: no accumulator, result written exactly once."""
    o_ref[...] = _chunk_logits(x_ref, dst_ref, typ_ref, w_ref, b_ref,
                               en_ref, et_ref, s_ref).astype(o_ref.dtype)


def _mtc_kernel_acc(x_ref, dst_ref, typ_ref, w_ref, b_ref, en_ref, et_ref,
                    s_ref, o_ref, acc_ref):
    """K-chunked case: f32 VMEM accumulator over the 'arbitrary' K-chunk axis."""
    kc = pl.program_id(1)

    @pl.when(kc == 0)
    def _init():
        acc_ref[...] = jnp.zeros_like(acc_ref)

    acc_ref[...] += _chunk_logits(x_ref, dst_ref, typ_ref, w_ref, b_ref,
                                  en_ref, et_ref, s_ref)

    @pl.when(kc == pl.num_programs(1) - 1)
    def _finalize():
        o_ref[...] = acc_ref[...].astype(o_ref.dtype)


# ---------------------------------------------------------------------------
# Tiling / VMEM helpers (padding-aware)
# ---------------------------------------------------------------------------

def _round_up(v, m):
    return -(-v // m) * m


def _padded_bytes(rows, cols, itemsize):
    """VMEM bytes of a [rows, cols] tile after (sublane, 128-lane) padding."""
    sub = 8 * (4 // itemsize)              # f32 -> (8,128) tiles, bf16 -> (16,128)
    return _round_up(max(rows, 1), sub) * _round_up(max(cols, 1), 128) * itemsize


def _vmem_capacity_bytes():
    try:
        return int(pltpu.get_tpu_info().vmem_capacity_bytes)
    except Exception:
        return 64 << 20                    # conservative: v7x per-TensorCore VMEM


def _vmem_estimate(tb, din, n_pad, t_pad, kb, dout, mm_itemsize, chunked):
    """Padding-aware VMEM estimate: double-buffered inputs/output + scratch."""
    nd = kb * dout
    est = 2 * _padded_bytes(tb, din, mm_itemsize)         # x
    est += 2 * _padded_bytes(tb, n_pad, 4)                # dst_state
    est += 2 * _padded_bytes(tb, t_pad, 4)                # type_state
    est += 2 * _padded_bytes(din, nd, mm_itemsize)        # fused weight chunk
    est += 2 * _padded_bytes(1, nd, 4)                    # bias chunk
    est += 2 * _padded_bytes(n_pad, nd, 4)                # dst selector chunk
    est += 2 * _padded_bytes(t_pad, nd, 4)                # type selector chunk
    est += 2 * _padded_bytes(nd, dout, 4)                 # grouped-sum matrix
    est += 2 * _padded_bytes(tb, dout, 4)                 # output
    if chunked:
        est += _padded_bytes(tb, dout, 4)                 # accumulator scratch
    return est


def _pick_k_chunk(K, dout, din, itemsize, budget_bytes):
    """Largest divisor-of-K chunk whose fused weight tile fits budget_bytes.

    Lane rule: when chunking (kb < K), kb*dout must be a multiple of 128.
    Never silently over-commits: falls back to the smallest legal chunk (the
    padded VMEM estimate downstream always covers the real tile size).
    """
    def w_bytes(kb):
        return _padded_bytes(din, kb * dout, itemsize)

    if w_bytes(K) <= budget_bytes:
        return K
    legal = [kb for kb in range(1, K) if K % kb == 0 and (kb * dout) % 128 == 0]
    within = [kb for kb in legal if w_bytes(kb) <= budget_bytes]
    if within:
        return max(within)
    if legal:
        return min(legal)
    return K


def _pick_batch_tile(B, target, est_fn, budget_bytes):
    """Large batch tile (>= 2 tiles when B allows, for v7x megacore), shrunk
    until the padded VMEM estimate fits the budget.  Tiles are multiples of 16
    so both f32 (8,128) and bf16 (16,128) layouts are natively aligned."""
    if B <= 64:
        return B                            # single tile; full-dim block is legal
    tb = min(target, _round_up(-(-B // 2), 16))
    while tb > 16 and est_fn(tb) > budget_bytes:
        tb = max(16, _round_up(tb // 2, 16))
    return tb


def _build_selectors(num_node, num_type, n_pad, t_pad, dout, kb, num_kc):
    """Constant 0/1 matrices: per-chunk dst/type selectors and grouped-sum.

    en3[kc, n, j*dout+o] = 1 iff (kc*kb + j) // num_type == n
    et3[kc, t, j*dout+o] = 1 iff (kc*kb + j) %  num_type == t
    s[j*dout+o, o'] = 1 iff o == o'
    Rows >= num_node / num_type (padding rows) are all-zero.
    """
    K = num_node * num_type
    k_of_col = jnp.arange(K * dout) // dout
    en = (jnp.arange(n_pad)[:, None] == (k_of_col // num_type)[None, :])
    et = (jnp.arange(t_pad)[:, None] == (k_of_col % num_type)[None, :])
    en3 = en.astype(jnp.float32).reshape(n_pad, num_kc, kb * dout).transpose(1, 0, 2)
    et3 = et.astype(jnp.float32).reshape(t_pad, num_kc, kb * dout).transpose(1, 0, 2)
    o_of_col = jnp.arange(kb * dout) % dout
    s = (o_of_col[:, None] == jnp.arange(dout)[None, :]).astype(jnp.float32)
    return en3, et3, s


# ---------------------------------------------------------------------------
# Parameter prep (call ONCE, not per forward step) and the forward wrapper
# ---------------------------------------------------------------------------

def prepare_params(weights, biases, dtype=jnp.bfloat16):
    """One-time parameter layout prep.

    weights : [K, Dout, Din]  (PyTorch nn.Linear layout, K = num_node*num_type)
    biases  : [K, Dout]
    returns : (w_fused [Din, K*Dout] in `dtype`, biases as f32); column
              k*Dout + o of w_fused holds layer k / output o.
    """
    K, dout, din = weights.shape
    w_fused = jnp.transpose(weights, (2, 0, 1)).reshape(din, K * dout)
    return w_fused.astype(dtype), biases.astype(jnp.float32)


def multi_type_categorical_logits(x, dst_state, type_state, w_fused, bias,
                                  num_node, num_type, *,
                                  k_chunk_budget_bytes=6 << 20,
                                  target_batch_tile=None):
    """Forward pass of MultiTypeCategorical; returns the Categorical logits.

    x          : [..., num_inputs]   (pass bf16 activations for the fast path)
    dst_state  : [..., num_node]
    type_state : [..., num_type]
    w_fused    : [num_inputs, K*num_outputs]   from prepare_params()
    bias       : [K, num_outputs]              from prepare_params()
    """
    lead = x.shape[:-1]
    din = x.shape[-1]
    K = num_node * num_type
    din_w, kd = w_fused.shape
    assert din_w == din and kd % K == 0
    dout = kd // K
    assert bias.shape == (K, dout)
    mm_dtype = w_fused.dtype
    itemsize = jnp.dtype(mm_dtype).itemsize

    # Flatten leading dims; cast x only if needed.  No ones-column concat and
    # no [B, K] coef materialization (both were extra HBM round trips).
    x2 = x.reshape(-1, din)
    if x2.dtype != mm_dtype:
        x2 = x2.astype(mm_dtype)
    B = x2.shape[0]

    # Pad dst/type lanes up to a multiple of 8 (tiny copies) so the selector
    # matmuls have a clean >=8 contraction dim; padded lanes multiply zeros.
    n_pad = max(8, _round_up(num_node, 8))
    t_pad = max(8, _round_up(num_type, 8))
    dst2 = dst_state.reshape(-1, num_node).astype(jnp.float32)
    typ2 = type_state.reshape(-1, num_type).astype(jnp.float32)
    dst2 = jnp.pad(dst2, ((0, 0), (0, n_pad - num_node)))
    typ2 = jnp.pad(typ2, ((0, 0), (0, t_pad - num_type)))

    # K chunking (usually num_kc == 1) and batch tiling under a padded VMEM cap.
    kb = _pick_k_chunk(K, dout, din, itemsize, k_chunk_budget_bytes)
    num_kc = K // kb
    chunked = num_kc > 1

    vmem_cap = _vmem_capacity_bytes()
    limit_cap = min((vmem_cap * 3) // 4, 96 << 20)   # ~48 MiB v7x, ~96 MiB v5e/v6e
    if target_batch_tile is None:
        target_batch_tile = 8192 if vmem_cap >= (96 << 20) else 4096

    def est_fn(t):
        return _vmem_estimate(t, din, n_pad, t_pad, kb, dout, itemsize, chunked)

    tb = _pick_batch_tile(B, target_batch_tile, est_fn, limit_cap - (4 << 20))
    nbt = pl.cdiv(B, tb)
    vmem_limit = int(min(max(est_fn(tb) + (4 << 20), 32 << 20), limit_cap))

    en3, et3, s_mat = _build_selectors(num_node, num_type, n_pad, t_pad,
                                       dout, kb, num_kc)
    bias_flat = bias.astype(jnp.float32).reshape(num_kc, 1, kb * dout)

    kernel = _mtc_kernel_acc if chunked else _mtc_kernel_direct
    scratch = [pltpu.VMEM((tb, dout), jnp.float32)] if chunked else []

    grid_spec = pltpu.PrefetchScalarGridSpec(
        num_scalar_prefetch=0,
        grid=(nbt, num_kc),
        in_specs=[
            pl.BlockSpec((tb, din), lambda bi, kc: (bi, 0)),
            pl.BlockSpec((tb, n_pad), lambda bi, kc: (bi, 0)),
            pl.BlockSpec((tb, t_pad), lambda bi, kc: (bi, 0)),
            pl.BlockSpec((din, kb * dout), lambda bi, kc: (0, kc)),
            pl.BlockSpec((pl.Squeezed(), 1, kb * dout), lambda bi, kc: (kc, 0, 0)),
            pl.BlockSpec((pl.Squeezed(), n_pad, kb * dout), lambda bi, kc: (kc, 0, 0)),
            pl.BlockSpec((pl.Squeezed(), t_pad, kb * dout), lambda bi, kc: (kc, 0, 0)),
            pl.BlockSpec((kb * dout, dout), lambda bi, kc: (0, 0)),
        ],
        out_specs=pl.BlockSpec((tb, dout), lambda bi, kc: (bi, 0)),
        scratch_shapes=scratch,
    )

    logits = pl.pallas_call(
        kernel,
        out_shape=jax.ShapeDtypeStruct((B, dout), jnp.float32),
        grid_spec=grid_spec,
        compiler_params=pltpu.CompilerParams(
            dimension_semantics=("parallel", "arbitrary"),
            vmem_limit_bytes=vmem_limit),
    )(x2, dst2, typ2, w_fused, bias_flat, en3, et3, s_mat)

    # TODO(synk): torch.distributions.Categorical itself has no Pallas
    # equivalent; apply jax.nn.log_softmax / categorical sampling to `logits`.
    return logits.reshape(*lead, dout)


# ---------------------------------------------------------------------------
# Reference, init, demo
# ---------------------------------------------------------------------------

def _reference_logits(x, dst_state, type_state, weights, biases):
    """Pure-JAX reference mirroring the PyTorch forward exactly."""
    y = jnp.einsum('bi,koi->bko', x, weights) + biases[None]           # [B,K,Dout]
    coef = (dst_state[:, :, None] * type_state[:, None, :]).reshape(x.shape[0], -1)
    return jnp.sum(y * coef[:, :, None], axis=-2)                      # [B,Dout]


def _init_params(key, num_inputs, num_outputs, num_node, num_type):
    """Matches the module __init__: orthogonal(gain=0.01) weights, zero bias."""
    K = num_node * num_type
    ortho = jax.nn.initializers.orthogonal(scale=0.01)
    keys = jax.random.split(key, K)
    weights = jnp.stack([ortho(keys[k], (num_outputs, num_inputs), jnp.float32)
                         for k in range(K)], axis=0)                   # [K,Dout,Din]
    biases = jnp.zeros((K, num_outputs), jnp.float32)
    return weights, biases


if __name__ == "__main__":
    num_inputs, num_outputs, num_node, num_type = 32, 16, 4, 3
    k_w, k_x, k_d, k_t, k_b = jax.random.split(jax.random.PRNGKey(0), 5)

    weights, biases = _init_params(k_w, num_inputs, num_outputs, num_node, num_type)
    # Non-zero biases so the in-kernel bias fold is actually exercised
    # (the module's own init sets biases to 0).
    biases = 0.01 * jax.random.normal(k_b, biases.shape, jnp.float32)

    # ---- small shape (batch=2): single batch tile, single K chunk ----------
    batch = 2
    x = jax.random.normal(k_x, (batch, num_inputs), jnp.float32)
    dst_state = jax.nn.softmax(jax.random.normal(k_d, (batch, num_node)), axis=-1)
    type_state = jax.nn.softmax(jax.random.normal(k_t, (batch, num_type)), axis=-1)
    ref = _reference_logits(x, dst_state, type_state, weights, biases)

    # f32 operand path (near-exact check).
    w_f32, b_f32 = prepare_params(weights, biases, dtype=jnp.float32)
    out_f32 = jax.block_until_ready(
        multi_type_categorical_logits(x, dst_state, type_state, w_f32, b_f32,
                                      num_node, num_type))
    assert out_f32.shape == (batch, num_outputs)
    assert jnp.allclose(out_f32, ref, atol=1e-4, rtol=1e-4), (out_f32, ref)

    # bf16 operand path (default; halves the dominant x / weight HBM streams,
    # f32 accumulation and f32 coef math inside the kernel).
    w_bf16, b_bf16 = prepare_params(weights, biases)                  # bf16 default
    out_bf16 = jax.block_until_ready(
        multi_type_categorical_logits(x.astype(jnp.bfloat16), dst_state,
                                      type_state, w_bf16, b_bf16,
                                      num_node, num_type))
    assert out_bf16.shape == (batch, num_outputs)
    assert jnp.allclose(out_bf16, ref, atol=5e-3, rtol=5e-2), (out_bf16, ref)

    # ---- batch=200: two batch tiles with a cdiv-padded final block ---------
    kx2, kd2, kt2 = jax.random.split(jax.random.PRNGKey(1), 3)
    b2 = 200
    x_big = jax.random.normal(kx2, (b2, num_inputs), jnp.float32)
    dst_big = jax.nn.softmax(jax.random.normal(kd2, (b2, num_node)), axis=-1)
    typ_big = jax.nn.softmax(jax.random.normal(kt2, (b2, num_type)), axis=-1)
    ref_big = _reference_logits(x_big, dst_big, typ_big, weights, biases)
    out_big = jax.block_until_ready(
        multi_type_categorical_logits(x_big, dst_big, typ_big, w_f32, b_f32,
                                      num_node, num_type))
    assert out_big.shape == (b2, num_outputs)
    assert jnp.allclose(out_big, ref_big, atol=1e-4, rtol=1e-4)

    # ---- config that forces K-chunking (accumulator kernel path) -----------
    nn_c, nt_c, no_c, b_c = 4, 2, 128, 16
    kw3, kb3, kx3, kd3, kt3 = jax.random.split(jax.random.PRNGKey(2), 5)
    w_c, _ = _init_params(kw3, num_inputs, no_c, nn_c, nt_c)
    bias_c = 0.01 * jax.random.normal(kb3, (nn_c * nt_c, no_c), jnp.float32)
    x_c = jax.random.normal(kx3, (b_c, num_inputs), jnp.float32)
    dst_c = jax.nn.softmax(jax.random.normal(kd3, (b_c, nn_c)), axis=-1)
    typ_c = jax.nn.softmax(jax.random.normal(kt3, (b_c, nt_c)), axis=-1)
    ref_c = _reference_logits(x_c, dst_c, typ_c, w_c, bias_c)
    wf_c, bf_c = prepare_params(w_c, bias_c, dtype=jnp.float32)
    out_c = jax.block_until_ready(
        multi_type_categorical_logits(x_c, dst_c, typ_c, wf_c, bf_c, nn_c, nt_c,
                                      k_chunk_budget_bytes=80 << 10))
    assert out_c.shape == (b_c, no_c)
    assert jnp.allclose(out_c, ref_c, atol=1e-4, rtol=1e-4)

    print("KERNEL_OK")
</pallas_src>

<mosaic_0001>
module attributes {stable_mosaic.version = 11 : i64} {
  func.func @_mtc_kernel_direct(%arg0: i32, %arg1: i32, %arg2: memref<2x32xf32, #tpu.memory_space<vmem>>, %arg3: memref<2x8xf32, #tpu.memory_space<vmem>>, %arg4: memref<2x8xf32, #tpu.memory_space<vmem>>, %arg5: memref<32x192xf32, #tpu.memory_space<vmem>>, %arg6: memref<1x1x192xf32, #tpu.memory_space<vmem>>, %arg7: memref<1x8x192xf32, #tpu.memory_space<vmem>>, %arg8: memref<1x8x192xf32, #tpu.memory_space<vmem>>, %arg9: memref<192x16xf32, #tpu.memory_space<vmem>>, %arg10: memref<2x16xf32, #tpu.memory_space<vmem>>) attributes {dimension_semantics = [#tpu.dimension_semantics<parallel>, #tpu.dimension_semantics<arbitrary>], iteration_bounds = array<i64: 1, 1>, scalar_prefetch = 0 : i64, scratch_operands = 0 : i64, tpu.core_type = #tpu.core_type<tc>, window_params = [{transform_indices = @transform_0, window_bounds = array<i64: 2, 32>}, {transform_indices = @transform_1, window_bounds = array<i64: 2, 8>}, {transform_indices = @transform_2, window_bounds = array<i64: 2, 8>}, {transform_indices = @transform_3, window_bounds = array<i64: 32, 192>}, {transform_indices = @transform_4, window_bounds = array<i64: 1, 1, 192>}, {transform_indices = @transform_5, window_bounds = array<i64: 1, 8, 192>}, {transform_indices = @transform_6, window_bounds = array<i64: 1, 8, 192>}, {pipeline_mode = #tpu.pipeline_mode<synchronous>, transform_indices = @transform_7, window_bounds = array<i64: 192, 16>}, {transform_indices = @transform_8, window_bounds = array<i64: 2, 16>}]} {
    %c0 = arith.constant 0 : index
    %c0_0 = arith.constant 0 : index
    %0 = vector.load %arg2[%c0, %c0_0] : memref<2x32xf32, #tpu.memory_space<vmem>>, vector<2x32xf32>
    %c0_1 = arith.constant 0 : index
    %c0_2 = arith.constant 0 : index
    %1 = vector.load %arg5[%c0_1, %c0_2] : memref<32x192xf32, #tpu.memory_space<vmem>>, vector<32x192xf32>
    %cst = arith.constant dense<0.000000e+00> : vector<2x192xf32>
    %2 = tpu.matmul %0, %1, %cst {dimension_numbers = #tpu.dot_dimension_numbers<[1], [0], [0], [1], [0, 0, 1, 1], [], []>} : vector<2x32xf32>, vector<32x192xf32>, vector<2x192xf32> -> vector<2x192xf32>
    %c0_3 = arith.constant 0 : index
    %c0_4 = arith.constant 0 : index
    %3 = vector.load %arg3[%c0_3, %c0_4] : memref<2x8xf32, #tpu.memory_space<vmem>>, vector<2x8xf32>
    %c0_5 = arith.constant 0 : index
    %c0_6 = arith.constant 0 : index
    %c0_7 = arith.constant 0 : index
    %4 = vector.load %arg7[%c0_5, %c0_6, %c0_7] : memref<1x8x192xf32, #tpu.memory_space<vmem>>, vector<1x8x192xf32>
    %5 = vector.shape_cast %4 : vector<1x8x192xf32> to vector<8x192xf32>
    %cst_8 = arith.constant dense<0.000000e+00> : vector<2x192xf32>
    %6 = tpu.matmul %3, %5, %cst_8 {dimension_numbers = #tpu.dot_dimension_numbers<[1], [0], [0], [1], [0, 0, 1, 1], [], []>} : vector<2x8xf32>, vector<8x192xf32>, vector<2x192xf32> -> vector<2x192xf32>
    %c0_9 = arith.constant 0 : index
    %c0_10 = arith.constant 0 : index
    %7 = vector.load %arg4[%c0_9, %c0_10] : memref<2x8xf32, #tpu.memory_space<vmem>>, vector<2x8xf32>
    %c0_11 = arith.constant 0 : index
    %c0_12 = arith.constant 0 : index
    %c0_13 = arith.constant 0 : index
    %8 = vector.load %arg8[%c0_11, %c0_12, %c0_13] : memref<1x8x192xf32, #tpu.memory_space<vmem>>, vector<1x8x192xf32>
    %9 = vector.shape_cast %8 : vector<1x8x192xf32> to vector<8x192xf32>
    %cst_14 = arith.constant dense<0.000000e+00> : vector<2x192xf32>
    %10 = tpu.matmul %7, %9, %cst_14 {dimension_numbers = #tpu.dot_dimension_numbers<[1], [0], [0], [1], [0, 0, 1, 1], [], []>} : vector<2x8xf32>, vector<8x192xf32>, vector<2x192xf32> -> vector<2x192xf32>
    %11 = arith.mulf %6, %10 : vector<2x192xf32>
    %c0_15 = arith.constant 0 : index
    %c0_16 = arith.constant 0 : index
    %c0_17 = arith.constant 0 : index
    %12 = vector.load %arg6[%c0_15, %c0_16, %c0_17] : memref<1x1x192xf32, #tpu.memory_space<vmem>>, vector<1x1x192xf32>
    %13 = vector.shape_cast %12 : vector<1x1x192xf32> to vector<1x192xf32>
    %14 = vector.broadcast %13 : vector<1x192xf32> to vector<2x192xf32>
    %15 = arith.addf %2, %14 : vector<2x192xf32>
    %16 = arith.mulf %15, %11 : vector<2x192xf32>
    %c0_18 = arith.constant 0 : index
    %c0_19 = arith.constant 0 : index
    %17 = vector.load %arg9[%c0_18, %c0_19] : memref<192x16xf32, #tpu.memory_space<vmem>>, vector<192x16xf32>
    %cst_20 = arith.constant dense<0.000000e+00> : vector<2x16xf32>
    %18 = tpu.matmul %16, %17, %cst_20 {dimension_numbers = #tpu.dot_dimension_numbers<[1], [0], [0], [1], [0, 0, 1, 1], [], []>} : vector<2x192xf32>, vector<192x16xf32>, vector<2x16xf32> -> vector<2x16xf32>
    %c0_21 = arith.constant 0 : index
    %c0_22 = arith.constant 0 : index
    %19 = vector.load %arg10[%c0_21, %c0_22] : memref<2x16xf32, #tpu.memory_space<vmem>>, vector<2x16xf32>
    tpu.vector_store %arg10[%c0_21, %c0_22], %18 {strides = array<i32>} : memref<2x16xf32, #tpu.memory_space<vmem>>, vector<2x16xf32>,
    return
  }
  func.func @transform_0(%arg0: i32, %arg1: i32) -> (i32, i32) {
    %c0_i32 = arith.constant 0 : i32
    %c0_i32_0 = arith.constant 0 : i32
    return %arg0, %c0_i32 : i32, i32
  }
  func.func @transform_1(%arg0: i32, %arg1: i32) -> (i32, i32) {
    %c0_i32 = arith.constant 0 : i32
    %c0_i32_0 = arith.constant 0 : i32
    return %arg0, %c0_i32 : i32, i32
  }
  func.func @transform_2(%arg0: i32, %arg1: i32) -> (i32, i32) {
    %c0_i32 = arith.constant 0 : i32
    %c0_i32_0 = arith.constant 0 : i32
    return %arg0, %c0_i32 : i32, i32
  }
  func.func @transform_3(%arg0: i32, %arg1: i32) -> (i32, i32) {
    %c0_i32 = arith.constant 0 : i32
    %c0_i32_0 = arith.constant 0 : i32
    return %c0_i32, %arg1 : i32, i32
  }
  func.func @transform_4(%arg0: i32, %arg1: i32) -> (i32, i32, i32) {
    %c0_i32 = arith.constant 0 : i32
    %c0_i32_0 = arith.constant 0 : i32
    %c0_i32_1 = arith.constant 0 : i32
    return %arg1, %c0_i32, %c0_i32_0 : i32, i32, i32
  }
  func.func @transform_5(%arg0: i32, %arg1: i32) -> (i32, i32, i32) {
    %c0_i32 = arith.constant 0 : i32
    %c0_i32_0 = arith.constant 0 : i32
    %c0_i32_1 = arith.constant 0 : i32
    return %arg1, %c0_i32, %c0_i32_0 : i32, i32, i32
  }
  func.func @transform_6(%arg0: i32, %arg1: i32) -> (i32, i32, i32) {
    %c0_i32 = arith.constant 0 : i32
    %c0_i32_0 = arith.constant 0 : i32
    %c0_i32_1 = arith.constant 0 : i32
    return %arg1, %c0_i32, %c0_i32_0 : i32, i32, i32
  }
  func.func @transform_7(%arg0: i32, %arg1: i32) -> (i32, i32) {
    %c0_i32 = arith.constant 0 : i32
    %c0_i32_0 = arith.constant 0 : i32
    %c0_i32_1 = arith.constant 0 : i32
    return %c0_i32, %c0_i32_0 : i32, i32
  }
  func.func @transform_8(%arg0: i32, %arg1: i32) -> (i32, i32) {
    %c0_i32 = arith.constant 0 : i32
    %c0_i32_0 = arith.constant 0 : i32
    return %arg0, %c0_i32 : i32, i32
  }
}

</mosaic_0001>

<bundles_post_ra>
// kernel: tpu_custom_call.1
= control target key start
LH: loop header
LB: loop body
LE: loop exit
PB: predicated region body
PF: predicated region fallthrough
CT: control target
= control target key end

     0   :  { %vm42_vm0 = vcmask 64512   ;;  %v474_v3 = vmov 0.0   ;;  %v475_v9 = vmov 0.0|0.0   ;;  %s668_s0 = inlined_call_operand.vmem [shape: f32[2,32], index: 0, kind: input, shape index: {}]   ;;  %s669_s1 = inlined_call_operand.vmem [shape: f32[2,8], index: 1, kind: input, shape index: {}]   ;;  %s670_s2 = inlined_call_operand.vmem [shape: f32[2,8], index: 2, kind: input, shape index: {}]   ;;  %s671_s3 = inlined_call_operand.vmem [shape: f32[32,192], index: 3, kind: input, shape index: {}]   ;;  %s672_s4 = inlined_call_operand.vmem [shape: f32[1,1,192], index: 4, kind: input, shape index: {}]   ;;  %s673_s5 = inlined_call_operand.vmem [shape: f32[1,8,192], index: 5, kind: input, shape index: {}]   ;;  %s674_s6 = inlined_call_operand.vmem [shape: f32[1,8,192], index: 6, kind: input, shape index: {}]   ;;  %s675_s7 = inlined_call_operand.vmem [shape: f32[192,16], index: 7, kind: input, shape index: {}]   ;;  %s676_s8 = inlined_call_operand.hbm [shape: f32[2,16], index: 8, kind: output, shape index: {}]  }
   0x1   :  { %v41_v0 = vld [vmem:[%s673_s5 + $0x8] sm:$0xff]  ;;  %v40_v1 = vld [vmem:[%s673_s5] sm:$0xff]  ;;  %110 = vmatprep.mubr.f32.mxu0 %v474_v3  ;;  %v34_v7 = vld [vmem:[%s671_s3 + $0x18] sm:$0xff]  ;;  %411 = vmatprep.subr.bf16.mxu1 %v475_v9 }
   0x2   :  { %v39_v2 = vld [vmem:[%s669_s1] sm:$0x3]  ;;  %46 = vmatprep.subr.mxu0 %v41_v0  ;;  %v119_v4 = vld [vmem:[%s674_s6 + $0x8] sm:$0xff]  ;;  %v33_v11 = vld [vmem:[%s671_s3 + $0x10] sm:$0xff] }
   0x3   :  { %v118_v5 = vld [vmem:[%s674_s6] sm:$0xff]  ;;  %v32_v6 = vld [vmem:[%s671_s3 + $0x8] sm:$0xff]  ;;  %47 = vmatpush1.msra.mxu0 %v40_v1  ;;  %v38_v13 = vld [vmem:[%s671_s3 + $0x38] sm:$0xff] }
   0x4   :  { %v31_v8 = vld [vmem:[%s671_s3] sm:$0xff]  ;;  %399 = vmatmul.mubr.msk.f32.vlgmr.msra.gmra.mrb[0].mxu0 %vm42_vm0, %v39_v2  ;;  %123 = vmatprep.subr.mxu0 %v119_v4  ;;  %v403_v10 = vpack.c.bf16 %v34_v7, %v32_v6  ;;  %v36_v12 = vld [vmem:[%s671_s3 + $0x28] sm:$0xff]  ;;  %v37_v18 = vld [vmem:[%s671_s3 + $0x30] sm:$0xff] }
   0x5   :  { %124 = vmatpush1.msra.mxu0 %v118_v5  ;;  %187 = vmatprep.mubr.f32.mxu0 %v474_v3  ;;  %v117_v14 = vld [vmem:[%s670_s2] sm:$0x3]  ;;  %v405_v15 = vpack.c.bf16 %v33_v11, %v31_v8  ;;  %v407_v17 = vpack.c.bf16 %v38_v13, %v36_v12  ;;  %v286_v20 = vld [vmem:[%s675_s7 + $0x8] sm:$0xff]  ;;  %v287_v22 = vld [vmem:[%s675_s7 + $0x10] sm:$0xff] }
   0x6   :  { %v35_v16 = vld [vmem:[%s671_s3 + $0x20] sm:$0xff]  ;;  %404 = vmatprep.subr.bf16.mxu0 %v403_v10  ;;  %v288_v23 = vld [vmem:[%s675_s7 + $0x18] sm:$0xff]  ;;  %v290_v27 = vld [vmem:[%s675_s7 + $0x28] sm:$0xff] }
   0x7   :  { %v285_v19 = vld [vmem:[%s675_s7] sm:$0xff]  ;;  %v409_v24 = vpack.c.bf16 %v37_v18, %v35_v16  ;;  %v415_v25 = vpack.c.bf16 %v288_v23, %v287_v22 }
   0x8   :  { %v412_v21 = vpack.c.bf16 %v286_v20, %v285_v19  ;;  %400 = vmatmul.mubr.msk.f32.vlgmr.msra.gmra.mrb[2].mxu0 %vm42_vm0, %v117_v14  ;;  %v289_v26 = vld [vmem:[%s675_s7 + $0x20] sm:$0xff] }
   0x9   :  { %406 = vmatpush1.bf16.msra.mxu0 %v405_v15  ;;  %276 = vmatprep.mubr.f32.mxu0 %v474_v3 }
   0xa   :  { %408 = vmatprep.subr.bf16.mxu0 %v407_v17  ;;  %413 = vmatpush1.bf16.msra.mxu1 %v412_v21 }
   0xb   :  { %414 = vmatprep.subr.bf16.mxu1 %v475_v9 }
   0xc   :  { %13 = vsyncpa [#allocation3], 0  ;;  %v30_v28 = vld [vmem:[%s668_s0] sm:$0x3]  ;;  %vm208_vm1 = vcmask 261120   ;;  %v418_v29 = vpack.c.bf16 %v290_v27, %v289_v26  ;;  %v291_v30 = vld [vmem:[%s675_s7 + $0x30] sm:$0xff]  ;;  %v198_v57 = vlaneseq }
   0xd   :  { %410 = vmatpush1.bf16.msra.mxu0 %v409_v24  ;;  %v292_v31 = vld [vmem:[%s675_s7 + $0x38] sm:$0xff]  ;;  %v293_v33 = vld [vmem:[%s675_s7 + $0x40] sm:$0xff]  ;;  %v294_v34 = vld [vmem:[%s675_s7 + $0x48] sm:$0xff]  ;;  %vm309_vm2 = vcmask 523264   ;;  %vm383_vm3 = vcmask 123904  }
   0xe   :  { %416 = vmatpush1.bf16.msra.mxu1 %v415_v25  ;;  %v421_v32 = vpack.c.bf16 %v292_v31, %v291_v30  ;;  %v424_v35 = vpack.c.bf16 %v294_v34, %v293_v33  ;;  %v295_v36 = vld [vmem:[%s675_s7 + $0x50] sm:$0xff]  ;;  %v296_v37 = vld [vmem:[%s675_s7 + $0x58] sm:$0xff]  ;;  %v297_v39 = vld [vmem:[%s675_s7 + $0x60] sm:$0xff]  ;;  %v199_v60 = vshrl.u32 %v198_v57, 7 }
   0xf   :  { %417 = vmatprep.subr.bf16.mxu1 %v475_v9  ;;  %v427_v38 = vpack.c.bf16 %v296_v37, %v295_v36  ;;  %v298_v40 = vld [vmem:[%s675_s7 + $0x68] sm:$0xff]  ;;  %v299_v42 = vld [vmem:[%s675_s7 + $0x70] sm:$0xff]  ;;  %v300_v43 = vld [vmem:[%s675_s7 + $0x78] sm:$0xff] }
  0x10   :  { %401 = vmatmul.mubr.msk.f32.vlgmr.msra.gmra.mrb[4].mxu0 %vm208_vm1, %v30_v28  ;;  %v430_v41 = vpack.c.bf16 %v298_v40, %v297_v39  ;;  %v433_v44 = vpack.c.bf16 %v300_v43, %v299_v42  ;;  %v301_v45 = vld [vmem:[%s675_s7 + $0x80] sm:$0xff]  ;;  %v302_v46 = vld [vmem:[%s675_s7 + $0x88] sm:$0xff]  ;;  %v303_v48 = vld [vmem:[%s675_s7 + $0x90] sm:$0xff]  ;;  %v200_v0 = vsub.s32 0, %v199_v60  ;;  %v204_v3 = vsub.s32 1, %v199_v60 }
  0x11   :  { %v436_v47 = vpack.c.bf16 %v302_v46, %v301_v45  ;;  %v304_v49 = vld [vmem:[%s675_s7 + $0x98] sm:$0xff]  ;;  %v305_v51 = vld [vmem:[%s675_s7 + $0xa0] sm:$0xff]  ;;  %v306_v52 = vld [vmem:[%s675_s7 + $0xa8] sm:$0xff] }
  0x12   :  { %419 = vmatpush1.bf16.msra.mxu1 %v418_v29  ;;  %v439_v50 = vpack.c.bf16 %v304_v49, %v303_v48  ;;  %v442_v53 = vpack.c.bf16 %v306_v52, %v305_v51  ;;  %v307_v54 = vld [vmem:[%s675_s7 + $0xb0] sm:$0xff]  ;;  %v308_v55 = vld [vmem:[%s675_s7 + $0xb8] sm:$0xff]  ;;  %v196_v2 = vld [vmem:[%s672_s4] sm:$0x3]  ;;  %s476_s7 = smov [#allocation2]  }
  0x13   :  { %420 = vmatprep.subr.bf16.mxu1 %v475_v9  ;;  %v445_v56 = vpack.c.bf16 %v308_v55, %v307_v54  ;;  %v201_v4 = vrot.slane %v196_v2, %v200_v0  ;;  %v205_v5 = vrot.slane %v196_v2, %v204_v3  ;;  %s391_s26 = sshll.u32 %s476_s7, 4  ;;  %s392_s26 = int_to_ptr.vmem [resolvable:$true] %s391_s26 }
  0x14   :  { %s450_s4 = scalar_lea.vmem %s392_s26, 32  ;;  %p455_p1 = scmp.lt.s32.totalorder %s392_s26, %s392_s26 }
  0x15   :  { %p451_p0 = scmp.ne.s32.totalorder %s392_s26, %s450_s4  ;;  %p456_p2 = scmp.lt.s32.totalorder %s450_s4, %s450_s4 }
  0x16   :  { %422 = vmatpush1.bf16.msra.mxu1 %v421_v32 }
  0x17   :  { %423 = vmatprep.subr.bf16.mxu1 %v475_v9  ;;  %p457_p3 = por %p456_p2, %p455_p1 }
  0x19   :  { %p458_p4 = pnand %p457_p3, %p451_p0 }
  0x1a   :  { %425 = vmatpush1.bf16.msra.mxu1 %v424_v35 }
  0x1b   :  { %426 = vmatprep.subr.bf16.mxu1 %v475_v9 }
  0x1e   :  { %428 = vmatpush1.bf16.msra.mxu1 %v427_v38 }
  0x1f   :  { %429 = vmatprep.subr.bf16.mxu1 %v475_v9 }
  0x22   :  { %431 = vmatpush1.bf16.msra.mxu1 %v430_v41 }
  0x23   :  { %432 = vmatprep.subr.bf16.mxu1 %v475_v9 }
  0x26   :  { %434 = vmatpush1.bf16.msra.mxu1 %v433_v44 }
  0x27   :  { %435 = vmatprep.subr.bf16.mxu1 %v475_v9 }
  0x2a   :  { %437 = vmatpush1.bf16.msra.mxu1 %v436_v47 }
  0x2b   :  { %438 = vmatprep.subr.bf16.mxu1 %v475_v9 }
  0x2e   :  { %440 = vmatpush1.bf16.msra.mxu1 %v439_v50 }
  0x2f   :  { %441 = vmatprep.subr.bf16.mxu1 %v475_v9 }
  0x32   :  { %443 = vmatpush1.bf16.msra.mxu1 %v442_v53 }
  0x33   :  { %444 = vmatprep.subr.bf16.mxu1 %v475_v9 }
  0x36   :  { %446 = vmatpush1.bf16.msra.mxu1 %v445_v56 }
  0xd7   :  { %v112_v58 = vpop.f32.mrb[0].mxu0 }
  0xd8   :  { %v114_v59 = vpop.f32.mrb[1].mxu0 }
  0xdb   :  { %v189_v61 = vpop.f32.mrb[2].mxu0 }
  0xdc   :  { %v194_v62 = vmul.f32 %v189_v61, %v112_v58  ;;  %v191_v63 = vpop.f32.mrb[3].mxu0 }
  0xdd   :  { %v195_v1 = vmul.f32 %v191_v63, %v114_v59 }
  0xe3   :  { %v278_v6 = vpop.f32.mrb[4].mxu0 }
  0xe4   :  { %v279_v7 = vadd.f32 %v278_v6, %v201_v4  ;;  %v280_v8 = vpop.f32.mrb[5].mxu0 }
  0xe5   :  { %v281_v9 = vadd.f32 %v280_v8, %v205_v5 }
  0xe6   :  { %v283_v10 = vmul.f32 %v279_v7, %v194_v62 }
  0xe7   :  { %v284_v11 = vmul.f32 %v281_v9, %v195_v1 }
  0xe9   :  { %402 = vmatprep.mubr.msk.f32.mxu1 %vm309_vm2, %v284_v11 }
  0xea   :  { %378 = vmatmul.mubr.f32.vlgmr.msra.gmra.mrb[0].mxu1 %v283_v10 }
 0x1bd   :  { %v379_v12 = vpop.f32.mrb[0].mxu1 }
 0x1be   :  { %384 = vst.msk [vmem:[#allocation2] sm:$0x3] %vm383_vm3, %v379_v12  ;;  %v381_v13 = vpop.f32.mrb[1].mxu1 }
 0x1bf   :  { %461 = shalt.err (!%p458_p4)
}
 0x1c0   :  { %s462_s29 = scalar_lea.hbm %s676_s8, 32 }
 0x1c1   :  { %p463_p5 = scmp.ne.s32.totalorder %s676_s8, %s462_s29  ;;  %p466_p6 = scmp.lt.u32.totalorder %s462_s29, %s676_s8 }
 0x1c3   :  { %p468_p7 = pnand %p466_p6, %p463_p5 }
 0x1c5   :  { %471 = shalt.err (!%p468_p7)
}
 0x1c6   :  { %394 = dma.vmem_to_hbm [thread:$0]  %s392_s26, 32, %s676_s8, [#allocation3]  }
 0x1c7   :  { %472 = dma.done.wait [#allocation3], 32  }
 0x1c8   :  { %473 = vsyncadd [#allocation3], 4294967264 }
 0x1c9   :  { %398 = vsyncpa [#allocation3], 1 }

</bundles_post_ra>
